<compile_context>
chip_gen: v5e
topology: v5e:2x2
jax: 0.10.0
libtpu: 0.0.40
codegen_flags: <defaults>
</compile_context>

<pallas_src>
import functools

import jax
import jax.numpy as jnp
from jax.experimental import pallas as pl
from jax.experimental.pallas import tpu as pltpu


def _dropout_kernel(x_ref, bits_ref, o_ref, *, threshold: int, inv_keep: float):
    # keep iff uniform uint32 bits < keep_prob * 2^32 (integer-space compare).
    keep = bits_ref[...] < jnp.uint32(threshold)
    # inv_keep = 1/keep_prob is a trace-time constant; do the scale in the
    # native dtype (no f32 round-trip) and a single select instead of a
    # float-mask multiply.
    scaled = x_ref[...] * jnp.asarray(inv_keep, dtype=x_ref.dtype)
    o_ref[...] = jnp.where(keep, scaled, jnp.zeros_like(scaled))


def custom_dropout(x: jax.Array, p: float = 0.5, *, training: bool = True,
                   key: jax.Array | None = None) -> jax.Array:
    """Pallas TPU implementation of CustomDropout.forward (inverted dropout)."""
    if not training or p == 0.0:
        return x
    if p >= 1.0:
        # keep_prob == 0: everything is dropped (avoid 0 * inf -> NaN).
        return jnp.zeros_like(x)

    keep_prob = 1.0 - float(p)
    inv_keep = 1.0 / keep_prob
    threshold = min(int(round(keep_prob * 2.0 ** 32)), 2 ** 32 - 1)

    if key is None:
        key = jax.random.PRNGKey(0)

    orig_shape = x.shape
    orig_dtype = x.dtype
    total = x.size

    # Lane-dense slab: last dim a multiple of 128 -> unmasked full-width vst.
    cols = 1024 if total >= 1024 else 128
    rows = pl.cdiv(total, cols)

    # Row tile: 512 rows * 1024 cols * 4 B = 2 MiB per buffer, comfortably
    # within v7x's 64 MiB VMEM with double-buffered x/bits/out, and large
    # enough to sit near the HBM roofline on v5e/v6e.
    tile_rows = 512
    if rows < tile_rows:
        tile_rows = ((rows + 7) // 8) * 8   # respect the (8, 128) tiling rule
    rows_padded = tile_rows * pl.cdiv(rows, tile_rows)
    padded_total = rows_padded * cols

    x_flat = x.reshape(-1)
    if padded_total != total:
        x_flat = jnp.pad(x_flat, (0, padded_total - total))
    x2d = x_flat.reshape(rows_padded, cols)

    # TODO(synk): mask bits are generated with jax.random and streamed into the
    # kernel instead of the on-chip pltpu.prng_* PRNG (which does not lower in
    # the interpret-mode check environment); on real hardware a per-tile
    # pltpu.prng_seed(seed + pl.program_id(0)) would remove one HBM read stream.
    bits = jax.random.bits(key, (rows_padded, cols), dtype=jnp.uint32)

    grid = (rows_padded // tile_rows,)
    out2d = pl.pallas_call(
        functools.partial(_dropout_kernel, threshold=threshold,
                          inv_keep=inv_keep),
        out_shape=jax.ShapeDtypeStruct((rows_padded, cols), orig_dtype),
        grid=grid,
        in_specs=[pl.BlockSpec((tile_rows, cols), lambda i: (i, 0)),
                  pl.BlockSpec((tile_rows, cols), lambda i: (i, 0))],
        out_specs=pl.BlockSpec((tile_rows, cols), lambda i: (i, 0)),
        compiler_params=pltpu.CompilerParams(
            dimension_semantics=("parallel",),      # megacore split on v7x
            vmem_limit_bytes=64 * 1024 * 1024),
    )(x2d, bits)

    out_flat = out2d.reshape(-1)
    if padded_total != total:
        out_flat = out_flat[:total]
    return out_flat.reshape(orig_shape)


if __name__ == "__main__":
    key = jax.random.PRNGKey(0)
    kx, kd = jax.random.split(key)
    # NCHW input, small shapes: batch=2, channels=4, spatial=16x16.
    x = jax.random.normal(kx, (2, 4, 16, 16), dtype=jnp.float32)

    p = 0.5
    y = custom_dropout(x, p=p, training=True, key=kd)
    y = jax.block_until_ready(y)

    assert y.shape == x.shape and y.dtype == x.dtype
    # Each output element is either 0 (dropped) or x / (1 - p) (kept, scaled).
    expected = x / (1.0 - p)
    ok = jnp.logical_or(y == 0.0, jnp.isclose(y, expected, rtol=1e-6, atol=1e-6))
    assert bool(jnp.all(ok))
    # Roughly half the elements should be kept (very loose statistical check).
    kept_frac = float(jnp.mean((y != 0).astype(jnp.float32)))
    assert 0.3 < kept_frac < 0.7

    # Eval mode is identity.
    y_eval = jax.block_until_ready(custom_dropout(x, p=p, training=False))
    assert bool(jnp.all(y_eval == x))

    # p = 1.0 drops everything (no NaNs).
    y_all = jax.block_until_ready(custom_dropout(x, p=1.0, training=True, key=kd))
    assert bool(jnp.all(y_all == 0.0))

    print("KERNEL_OK")
</pallas_src>

<mosaic_0001>
module attributes {stable_mosaic.version = 11 : i64} {
  func.func @_dropout_kernel(%arg0: i32, %arg1: memref<8x1024xf32, #tpu.memory_space<vmem>>, %arg2: memref<8x1024xi32, #tpu.memory_space<vmem>>, %arg3: memref<8x1024xf32, #tpu.memory_space<vmem>>) attributes {dimension_semantics = [#tpu.dimension_semantics<parallel>], iteration_bounds = array<i64: 1>, scalar_prefetch = 0 : i64, scratch_operands = 0 : i64, tpu.core_type = #tpu.core_type<tc>, window_params = [{transform_indices = @transform_0, window_bounds = array<i64: 8, 1024>}, {transform_indices = @transform_1, window_bounds = array<i64: 8, 1024>}, {transform_indices = @transform_2, window_bounds = array<i64: 8, 1024>}]} {
    %c0 = arith.constant 0 : index
    %c0_0 = arith.constant 0 : index
    %0 = vector.load %arg2[%c0, %c0_0] : memref<8x1024xi32, #tpu.memory_space<vmem>>, vector<8x1024xi32>
    %c-2147483648_i32 = arith.constant -2147483648 : i32
    %1 = vector.broadcast %c-2147483648_i32 : i32 to vector<8x1024xi32>
    %2 = arith.cmpi ult, %0, %1 : vector<8x1024xi32>
    %c0_1 = arith.constant 0 : index
    %c0_2 = arith.constant 0 : index
    %3 = vector.load %arg1[%c0_1, %c0_2] : memref<8x1024xf32, #tpu.memory_space<vmem>>, vector<8x1024xf32>
    %cst = arith.constant 2.000000e+00 : f32
    %4 = vector.broadcast %cst : f32 to vector<8x1024xf32>
    %5 = arith.mulf %3, %4 : vector<8x1024xf32>
    %cst_3 = arith.constant 0.000000e+00 : f32
    %6 = vector.broadcast %cst_3 : f32 to vector<8x1024xf32>
    %7 = arith.select %2, %5, %6 : vector<8x1024xi1>, vector<8x1024xf32>
    %c0_4 = arith.constant 0 : index
    %c0_5 = arith.constant 0 : index
    %8 = vector.load %arg3[%c0_4, %c0_5] : memref<8x1024xf32, #tpu.memory_space<vmem>>, vector<8x1024xf32>
    tpu.vector_store %arg3[%c0_4, %c0_5], %7 {strides = array<i32>} : memref<8x1024xf32, #tpu.memory_space<vmem>>, vector<8x1024xf32>,
    return
  }
  func.func @transform_0(%arg0: i32) -> (i32, i32) {
    %c0_i32 = arith.constant 0 : i32
    %c0_i32_0 = arith.constant 0 : i32
    return %arg0, %c0_i32 : i32, i32
  }
  func.func @transform_1(%arg0: i32) -> (i32, i32) {
    %c0_i32 = arith.constant 0 : i32
    %c0_i32_0 = arith.constant 0 : i32
    return %arg0, %c0_i32 : i32, i32
  }
  func.func @transform_2(%arg0: i32) -> (i32, i32) {
    %c0_i32 = arith.constant 0 : i32
    %c0_i32_0 = arith.constant 0 : i32
    return %arg0, %c0_i32 : i32, i32
  }
}

</mosaic_0001>

<bundles_post_ra>
// kernel: tpu_custom_call.1
= control target key start
LH: loop header
LB: loop body
LE: loop exit
PB: predicated region body
PF: predicated region fallthrough
CT: control target
= control target key end

     0   :  { %7 = vsyncpa [#allocation3], 0  ;;  %s263_s0 = inlined_call_operand.hbm [shape: f32[8,1024], index: 0, kind: input, shape index: {}]   ;;  %s264_s1 = inlined_call_operand.hbm [shape: u32[8,1024], index: 1, kind: input, shape index: {}]   ;;  %s265_s2 = inlined_call_operand.hbm [shape: f32[8,1024], index: 2, kind: output, shape index: {}]  }
   0x1   :  { %8 = vsyncpa [#allocation6], 0 }
   0x2   :  { %9 = vsyncpa [#allocation4], 0  ;;  %s15_s11 = sshll.u32 %s263_s0, 4  ;;  %s211_s12 = smov [#allocation2]   ;;  %s16_s11 = int_to_ptr.hbm [resolvable:$true] %s15_s11 }
   0x3   :  { %s17_s13 = sshll.u32 %s211_s12, 4  ;;  %s26_s16 = sshll.u32 %s264_s1, 4  ;;  %s18_s13 = int_to_ptr.vmem [resolvable:$true] %s17_s13  ;;  %s27_s16 = int_to_ptr.hbm [resolvable:$true] %s26_s16 }
   0x4   :  { %20 = dma.hbm_to_vmem [thread:$0]  %s16_s11, 1024, %s18_s13, [#allocation3]  }
   0x5   :  { %s212_s17 = smov [#allocation5]  }
   0x6   :  { %s28_s18 = sshll.u32 %s212_s17, 4  ;;  %s29_s18 = int_to_ptr.vmem [resolvable:$true] %s28_s18 }
   0x7   :  { %31 = dma.hbm_to_vmem [thread:$0]  %s27_s16, 1024, %s29_s18, [#allocation6]  }
   0x8   :  { %205 = dma.done.wait [#allocation3], 1024  }
   0x9   :  { %206 = vsyncadd [#allocation3], 4294966272 }
   0xa   :  { %207 = dma.done.wait [#allocation6], 1024  }
   0xb   :  { %208 = vsyncadd [#allocation6], 4294966272  ;;  %v40_v0 = vld [vmem:[#allocation5] sm:$0xff]  ;;  %v41_v2 = vld [vmem:[#allocation5 + $0x8] sm:$0xff]  ;;  %s213_s0 = smov [#allocation7]   ;;  %s111_s1 = sshll.u32 %s265_s2, 4  ;;  %s112_s1 = int_to_ptr.hbm [resolvable:$true] %s111_s1 }
   0xc   :  { %v72_v1 = vld [vmem:[#allocation2] sm:$0xff]  ;;  %s235_s19 = sshll.u32 %s213_s0, 4  ;;  %v122_v3 = vxor.u32 2147483648, %v40_v0  ;;  %v123_v5 = vxor.u32 2147483648, %v41_v2  ;;  %v73_v6 = vld [vmem:[#allocation2 + $0x8] sm:$0xff]  ;;  %v42_v7 = vld [vmem:[#allocation5 + $0x10] sm:$0xff]  ;;  %s110_s19 = int_to_ptr.vmem [resolvable:$true] %s235_s19 }
   0xd   :  { %v80_v4 = vmul.f32 2.0, %v72_v1  ;;  %v74_v8 = vld [vmem:[#allocation2 + $0x10] sm:$0xff]  ;;  %v81_v9 = vmul.f32 2.0, %v73_v6  ;;  %v124_v10 = vxor.u32 2147483648, %v42_v7  ;;  %v43_v12 = vld [vmem:[#allocation5 + $0x18] sm:$0xff]  ;;  %v44_v14 = vld [vmem:[#allocation5 + $0x20] sm:$0xff] }
   0xe   :  { %v82_v11 = vmul.f32 2.0, %v74_v8  ;;  %v75_v13 = vld [vmem:[#allocation2 + $0x18] sm:$0xff]  ;;  %vm50_vm0 = vcmp.lt.s32.totalorder %v122_v3, 0  ;;  %vm240_vm1 = vcmp.lt.s32.totalorder %v123_v5, 0  ;;  %v125_v16 = vxor.u32 2147483648, %v43_v12  ;;  %v76_v18 = vld [vmem:[#allocation2 + $0x20] sm:$0xff] }
   0xf   :  { %v83_v17 = vmul.f32 2.0, %v75_v13  ;;  %v45_v19 = vld [vmem:[#allocation5 + $0x28] sm:$0xff]  ;;  %v88_v20 = vsel %vm50_vm0, %v80_v4, 0.0  ;;  %v89_v21 = vsel %vm240_vm1, %v81_v9, 0.0  ;;  %vm246_vm2 = vcmp.lt.s32.totalorder %v124_v10, 0  ;;  %v46_v25 = vld [vmem:[#allocation5 + $0x30] sm:$0xff] }
  0x10   :  { %v126_v23 = vxor.u32 2147483648, %v44_v14  ;;  %v77_v24 = vld [vmem:[#allocation2 + $0x28] sm:$0xff]  ;;  %96 = vst [vmem:[#allocation7] sm:$0xff] %v88_v20  ;;  %v90_v26 = vsel %vm246_vm2, %v82_v11, 0.0  ;;  %vm252_vm3 = vcmp.lt.s32.totalorder %v125_v16, 0  ;;  %v84_v28 = vmul.f32 2.0, %v76_v18 }
  0x11   :  { %v127_v29 = vxor.u32 2147483648, %v45_v19  ;;  %v78_v30 = vld [vmem:[#allocation2 + $0x30] sm:$0xff]  ;;  %97 = vst [vmem:[#allocation7 + $0x8] sm:$0xff] %v89_v21  ;;  %v91_v31 = vsel %vm252_vm3, %v83_v17, 0.0  ;;  %v85_v32 = vmul.f32 2.0, %v77_v24  ;;  %v128_v33 = vxor.u32 2147483648, %v46_v25 }
  0x12   :  { %vm62_vm4 = vcmp.lt.s32.totalorder %v126_v23, 0  ;;  %v47_v34 = vld [vmem:[#allocation5 + $0x38] sm:$0xff]  ;;  %98 = vst [vmem:[#allocation7 + $0x10] sm:$0xff] %v90_v26  ;;  %v86_v36 = vmul.f32 2.0, %v78_v30 }
  0x13   :  { %v92_v35 = vsel %vm62_vm4, %v84_v28, 0.0  ;;  %vm65_vm5 = vcmp.lt.s32.totalorder %v127_v29, 0  ;;  %v129_v37 = vxor.u32 2147483648, %v47_v34  ;;  %v79_v38 = vld [vmem:[#allocation2 + $0x38] sm:$0xff]  ;;  %99 = vst [vmem:[#allocation7 + $0x18] sm:$0xff] %v91_v31  ;;  %vm68_vm6 = vcmp.lt.s32.totalorder %v128_v33, 0 }
  0x14   :  { %v93_v39 = vsel %vm65_vm5, %v85_v32, 0.0  ;;  %v87_v40 = vmul.f32 2.0, %v79_v38  ;;  %100 = vst [vmem:[#allocation7 + $0x20] sm:$0xff] %v92_v35  ;;  %v94_v41 = vsel %vm68_vm6, %v86_v36, 0.0 }
  0x15   :  { %vm71_vm7 = vcmp.lt.s32.totalorder %v129_v37, 0  ;;  %101 = vst [vmem:[#allocation7 + $0x28] sm:$0xff] %v93_v39 }
  0x16   :  { %v95_v42 = vsel %vm71_vm7, %v87_v40, 0.0  ;;  %102 = vst [vmem:[#allocation7 + $0x30] sm:$0xff] %v94_v41 }
  0x17   :  { %103 = vst [vmem:[#allocation7 + $0x38] sm:$0xff] %v95_v42 }
  0x18   :  { %114 = dma.vmem_to_hbm [thread:$0]  %s110_s19, 1024, %s112_s1, [#allocation4]  }
  0x19   :  { %209 = dma.done.wait [#allocation4], 1024  }
  0x1a   :  { %210 = vsyncadd [#allocation4], 4294966272 }
  0x1b   :  { %119 = vsyncpa [#allocation3], 1 }
  0x1c   :  { %120 = vsyncpa [#allocation6], 1 }
  0x1d   :  { %121 = vsyncpa [#allocation4], 1 }

</bundles_post_ra>
